<compile_context>
chip_gen: v7x
topology: tpu7x:2x2x1
jax: 0.10.0
libtpu: 0.0.40
codegen_flags: <defaults>
</compile_context>

<pallas_src>
import jax
import jax.numpy as jnp
from jax.experimental import pallas as pl
from jax.experimental.pallas import tpu as pltpu


def _round_up(x, m):
    return ((x + m - 1) // m) * m


def _actor_kernel(ma_ref, x_ref, w1_ref, b1_ref, w2_ref, b2_ref,
                  w3_ref, b3_ref, o_ref):
    max_action = ma_ref[0, 0]                       # SMEM scalar (sreg load)
    # Layer 1: Linear + ReLU  (MXU matmul, f32 accumulation)
    h = jnp.dot(x_ref[...], w1_ref[...], preferred_element_type=jnp.float32)
    h = jnp.maximum(h + b1_ref[...], 0.0)
    # Layer 2: Linear + ReLU
    h = jnp.dot(h, w2_ref[...], preferred_element_type=jnp.float32)
    h = jnp.maximum(h + b2_ref[...], 0.0)
    # Layer 3 (output): Linear, then max_action * tanh (tanh -> EUP)
    h = jnp.dot(h, w3_ref[...], preferred_element_type=jnp.float32)
    o_ref[...] = (max_action * jnp.tanh(h + b3_ref[...])).astype(o_ref.dtype)


def actor_forward(x, params, max_action, *, tile_b=None):
    """Fused forward pass of the Actor MLP as a single gridded Pallas kernel.

    x:      (B, state_dim) float32
    params: dict with w1 (S,H1), b1 (1,H1), w2 (H1,H2), b2 (1,H2),
                      w3 (H2,A), b3 (1,A)  -- weights already transposed.
    """
    B, S = x.shape
    H1 = params["w1"].shape[1]
    H2 = params["w2"].shape[1]
    A = params["w3"].shape[1]

    # Lane-align every feature dim; sublane/tile-align the batch.
    S_p = _round_up(S, 128)
    H1_p = _round_up(H1, 128)
    H2_p = _round_up(H2, 128)
    A_p = _round_up(A, 128)
    if tile_b is None:
        # Small batches: one tile.  Large batches: 512-row tiles (safe for
        # v7x's 64 MiB VMEM with double-buffered activations).
        tile_b = max(8, min(512, _round_up(B, 8)))
    B_p = _round_up(B, tile_b)

    f32 = jnp.float32
    # Zero-padding is numerically inert: padded weight columns are zero and
    # padded biases are zero, so padded hidden lanes are ReLU(0)=0 and
    # contribute nothing downstream; padded output lanes are sliced off.
    xp = jnp.zeros((B_p, S_p), f32).at[:B, :S].set(x.astype(f32))
    w1 = jnp.zeros((S_p, H1_p), f32).at[:S, :H1].set(params["w1"])
    b1 = jnp.zeros((1, H1_p), f32).at[:, :H1].set(params["b1"])
    w2 = jnp.zeros((H1_p, H2_p), f32).at[:H1, :H2].set(params["w2"])
    b2 = jnp.zeros((1, H2_p), f32).at[:, :H2].set(params["b2"])
    w3 = jnp.zeros((H2_p, A_p), f32).at[:H2, :A].set(params["w3"])
    b3 = jnp.zeros((1, A_p), f32).at[:, :A].set(params["b3"])
    ma = jnp.full((1, 1), max_action, f32)          # SMEM scalar, no recompile

    def const_spec(shape):
        # Weights/biases: same block every grid step -> stay resident in VMEM.
        return pl.BlockSpec(shape, lambda i: (0, 0))

    out_padded = pl.pallas_call(
        _actor_kernel,
        out_shape=jax.ShapeDtypeStruct((B_p, A_p), f32),
        grid=(B_p // tile_b,),
        in_specs=[
            pl.BlockSpec(memory_space=pltpu.MemorySpace.SMEM),   # max_action
            pl.BlockSpec((tile_b, S_p), lambda i: (i, 0)),       # x batch tile
            const_spec((S_p, H1_p)), const_spec((1, H1_p)),      # w1, b1
            const_spec((H1_p, H2_p)), const_spec((1, H2_p)),     # w2, b2
            const_spec((H2_p, A_p)), const_spec((1, A_p)),       # w3, b3
        ],
        out_specs=pl.BlockSpec((tile_b, A_p), lambda i: (i, 0)),
        compiler_params=pltpu.CompilerParams(
            dimension_semantics=("parallel",)),                  # v7x dual-TC
    )(ma, xp, w1, b1, w2, b2, w3, b3)

    return out_padded[:B, :A]


def init_actor_params(key, state_dim, dims_inner, action_dim):
    """Deterministic init mimicking PyTorch nn.Linear defaults:
    U(-1/sqrt(fan_in), 1/sqrt(fan_in)) for both weight and bias."""
    dims = [state_dim] + list(dims_inner) + [action_dim]
    params = {}
    for i in range(1, len(dims)):
        fan_in, fan_out = dims[i - 1], dims[i]
        key, kw, kb = jax.random.split(key, 3)
        bound = 1.0 / jnp.sqrt(fan_in)
        # stored transposed: (in, out)
        params[f"w{i}"] = jax.random.uniform(
            kw, (fan_in, fan_out), jnp.float32, -bound, bound)
        params[f"b{i}"] = jax.random.uniform(
            kb, (1, fan_out), jnp.float32, -bound, bound)
    return params


def actor_reference(x, params, max_action):
    """Plain-JAX reference for correctness checking."""
    h = jnp.maximum(x @ params["w1"] + params["b1"], 0.0)
    h = jnp.maximum(h @ params["w2"] + params["b2"], 0.0)
    return max_action * jnp.tanh(h @ params["w3"] + params["b3"])


if __name__ == "__main__":
    # Small shapes consistent with the module's forward:
    batch, state_dim, dims_inner, action_dim = 2, 16, [32, 32], 8
    max_action = 2.0

    key = jax.random.PRNGKey(0)
    key, kx = jax.random.split(key)
    x = jax.random.normal(kx, (batch, state_dim), jnp.float32)
    params = init_actor_params(key, state_dim, dims_inner, action_dim)

    out = actor_forward(x, params, max_action)
    out = jax.block_until_ready(out)
    ref = actor_reference(x, params, max_action)
    assert out.shape == (batch, action_dim)
    assert jnp.allclose(out, ref, atol=1e-5, rtol=1e-5)

    # Secondary check: exercise the multi-tile batch grid (grid > 1) and the
    # non-multiple-of-tile batch padding path.
    key, kx2 = jax.random.split(key)
    x_big = jax.random.normal(kx2, (20, state_dim), jnp.float32)
    out_big = jax.block_until_ready(
        actor_forward(x_big, params, max_action, tile_b=8))
    ref_big = actor_reference(x_big, params, max_action)
    assert out_big.shape == (20, action_dim)
    assert jnp.allclose(out_big, ref_big, atol=1e-5, rtol=1e-5)

    print("KERNEL_OK")
</pallas_src>

<mosaic_0001>
module attributes {stable_mosaic.version = 11 : i64} {
  func.func @_actor_kernel(%arg0: i32, %arg1: memref<1x1xf32, #tpu.memory_space<smem>>, %arg2: memref<8x128xf32, #tpu.memory_space<vmem>>, %arg3: memref<128x128xf32, #tpu.memory_space<vmem>>, %arg4: memref<1x128xf32, #tpu.memory_space<vmem>>, %arg5: memref<128x128xf32, #tpu.memory_space<vmem>>, %arg6: memref<1x128xf32, #tpu.memory_space<vmem>>, %arg7: memref<128x128xf32, #tpu.memory_space<vmem>>, %arg8: memref<1x128xf32, #tpu.memory_space<vmem>>, %arg9: memref<8x128xf32, #tpu.memory_space<vmem>>) attributes {dimension_semantics = [#tpu.dimension_semantics<parallel>], iteration_bounds = array<i64: 1>, scalar_prefetch = 0 : i64, scratch_operands = 0 : i64, tpu.core_type = #tpu.core_type<tc>, window_params = [{transform_indices = @transform_0, window_bounds = array<i64: 1, 1>}, {transform_indices = @transform_1, window_bounds = array<i64: 8, 128>}, {pipeline_mode = #tpu.pipeline_mode<synchronous>, transform_indices = @transform_2, window_bounds = array<i64: 128, 128>}, {pipeline_mode = #tpu.pipeline_mode<synchronous>, transform_indices = @transform_3, window_bounds = array<i64: 1, 128>}, {pipeline_mode = #tpu.pipeline_mode<synchronous>, transform_indices = @transform_4, window_bounds = array<i64: 128, 128>}, {pipeline_mode = #tpu.pipeline_mode<synchronous>, transform_indices = @transform_5, window_bounds = array<i64: 1, 128>}, {pipeline_mode = #tpu.pipeline_mode<synchronous>, transform_indices = @transform_6, window_bounds = array<i64: 128, 128>}, {pipeline_mode = #tpu.pipeline_mode<synchronous>, transform_indices = @transform_7, window_bounds = array<i64: 1, 128>}, {transform_indices = @transform_8, window_bounds = array<i64: 8, 128>}]} {
    %c0 = arith.constant 0 : index
    %c0_0 = arith.constant 0 : index
    %0 = memref.load %arg1[%c0, %c0_0] : memref<1x1xf32, #tpu.memory_space<smem>>
    %c0_1 = arith.constant 0 : index
    %c0_2 = arith.constant 0 : index
    %1 = vector.load %arg2[%c0_1, %c0_2] : memref<8x128xf32, #tpu.memory_space<vmem>>, vector<8x128xf32>
    %c0_3 = arith.constant 0 : index
    %c0_4 = arith.constant 0 : index
    %2 = vector.load %arg3[%c0_3, %c0_4] : memref<128x128xf32, #tpu.memory_space<vmem>>, vector<128x128xf32>
    %cst = arith.constant dense<0.000000e+00> : vector<8x128xf32>
    %3 = tpu.matmul %1, %2, %cst {dimension_numbers = #tpu.dot_dimension_numbers<[1], [0], [0], [1], [0, 0, 1, 1], [], []>} : vector<8x128xf32>, vector<128x128xf32>, vector<8x128xf32> -> vector<8x128xf32>
    %c0_5 = arith.constant 0 : index
    %c0_6 = arith.constant 0 : index
    %4 = vector.load %arg4[%c0_5, %c0_6] : memref<1x128xf32, #tpu.memory_space<vmem>>, vector<1x128xf32>
    %5 = vector.broadcast %4 : vector<1x128xf32> to vector<8x128xf32>
    %6 = arith.addf %3, %5 : vector<8x128xf32>
    %cst_7 = arith.constant 0.000000e+00 : f32
    %7 = vector.broadcast %cst_7 : f32 to vector<8x128xf32>
    %8 = arith.maximumf %6, %7 : vector<8x128xf32>
    %c0_8 = arith.constant 0 : index
    %c0_9 = arith.constant 0 : index
    %9 = vector.load %arg5[%c0_8, %c0_9] : memref<128x128xf32, #tpu.memory_space<vmem>>, vector<128x128xf32>
    %cst_10 = arith.constant dense<0.000000e+00> : vector<8x128xf32>
    %10 = tpu.matmul %8, %9, %cst_10 {dimension_numbers = #tpu.dot_dimension_numbers<[1], [0], [0], [1], [0, 0, 1, 1], [], []>} : vector<8x128xf32>, vector<128x128xf32>, vector<8x128xf32> -> vector<8x128xf32>
    %c0_11 = arith.constant 0 : index
    %c0_12 = arith.constant 0 : index
    %11 = vector.load %arg6[%c0_11, %c0_12] : memref<1x128xf32, #tpu.memory_space<vmem>>, vector<1x128xf32>
    %12 = vector.broadcast %11 : vector<1x128xf32> to vector<8x128xf32>
    %13 = arith.addf %10, %12 : vector<8x128xf32>
    %cst_13 = arith.constant 0.000000e+00 : f32
    %14 = vector.broadcast %cst_13 : f32 to vector<8x128xf32>
    %15 = arith.maximumf %13, %14 : vector<8x128xf32>
    %c0_14 = arith.constant 0 : index
    %c0_15 = arith.constant 0 : index
    %16 = vector.load %arg7[%c0_14, %c0_15] : memref<128x128xf32, #tpu.memory_space<vmem>>, vector<128x128xf32>
    %cst_16 = arith.constant dense<0.000000e+00> : vector<8x128xf32>
    %17 = tpu.matmul %15, %16, %cst_16 {dimension_numbers = #tpu.dot_dimension_numbers<[1], [0], [0], [1], [0, 0, 1, 1], [], []>} : vector<8x128xf32>, vector<128x128xf32>, vector<8x128xf32> -> vector<8x128xf32>
    %c0_17 = arith.constant 0 : index
    %c0_18 = arith.constant 0 : index
    %18 = vector.load %arg8[%c0_17, %c0_18] : memref<1x128xf32, #tpu.memory_space<vmem>>, vector<1x128xf32>
    %19 = vector.broadcast %18 : vector<1x128xf32> to vector<8x128xf32>
    %20 = arith.addf %17, %19 : vector<8x128xf32>
    %21 = math.tanh %20 : vector<8x128xf32>
    %22 = vector.broadcast %0 : f32 to vector<8x128xf32>
    %23 = arith.mulf %22, %21 : vector<8x128xf32>
    %c0_19 = arith.constant 0 : index
    %c0_20 = arith.constant 0 : index
    %24 = vector.load %arg9[%c0_19, %c0_20] : memref<8x128xf32, #tpu.memory_space<vmem>>, vector<8x128xf32>
    tpu.vector_store %arg9[%c0_19, %c0_20], %23 {strides = array<i32>} : memref<8x128xf32, #tpu.memory_space<vmem>>, vector<8x128xf32>,
    return
  }
  func.func @transform_0(%arg0: i32) -> (i32, i32) {
    %c0_i32 = arith.constant 0 : i32
    %c0_i32_0 = arith.constant 0 : i32
    %c0_i32_1 = arith.constant 0 : i32
    return %c0_i32, %c0_i32_0 : i32, i32
  }
  func.func @transform_1(%arg0: i32) -> (i32, i32) {
    %c0_i32 = arith.constant 0 : i32
    %c0_i32_0 = arith.constant 0 : i32
    return %arg0, %c0_i32 : i32, i32
  }
  func.func @transform_2(%arg0: i32) -> (i32, i32) {
    %c0_i32 = arith.constant 0 : i32
    %c0_i32_0 = arith.constant 0 : i32
    %c0_i32_1 = arith.constant 0 : i32
    return %c0_i32, %c0_i32_0 : i32, i32
  }
  func.func @transform_3(%arg0: i32) -> (i32, i32) {
    %c0_i32 = arith.constant 0 : i32
    %c0_i32_0 = arith.constant 0 : i32
    %c0_i32_1 = arith.constant 0 : i32
    return %c0_i32, %c0_i32_0 : i32, i32
  }
  func.func @transform_4(%arg0: i32) -> (i32, i32) {
    %c0_i32 = arith.constant 0 : i32
    %c0_i32_0 = arith.constant 0 : i32
    %c0_i32_1 = arith.constant 0 : i32
    return %c0_i32, %c0_i32_0 : i32, i32
  }
  func.func @transform_5(%arg0: i32) -> (i32, i32) {
    %c0_i32 = arith.constant 0 : i32
    %c0_i32_0 = arith.constant 0 : i32
    %c0_i32_1 = arith.constant 0 : i32
    return %c0_i32, %c0_i32_0 : i32, i32
  }
  func.func @transform_6(%arg0: i32) -> (i32, i32) {
    %c0_i32 = arith.constant 0 : i32
    %c0_i32_0 = arith.constant 0 : i32
    %c0_i32_1 = arith.constant 0 : i32
    return %c0_i32, %c0_i32_0 : i32, i32
  }
  func.func @transform_7(%arg0: i32) -> (i32, i32) {
    %c0_i32 = arith.constant 0 : i32
    %c0_i32_0 = arith.constant 0 : i32
    %c0_i32_1 = arith.constant 0 : i32
    return %c0_i32, %c0_i32_0 : i32, i32
  }
  func.func @transform_8(%arg0: i32) -> (i32, i32) {
    %c0_i32 = arith.constant 0 : i32
    %c0_i32_0 = arith.constant 0 : i32
    return %arg0, %c0_i32 : i32, i32
  }
}

</mosaic_0001>

<bundles_post_ra>
// kernel: tpu_custom_call.1
= control target key start
LH: loop header
LB: loop body
LE: loop exit
PB: predicated region body
PF: predicated region fallthrough
CT: control target
= control target key end

     0   :  { %14 = vsyncpa [#allocation4], 0  ;;  %s915_s0 = inlined_call_operand.<no memory space> [shape: f32[1,1], index: 0, kind: input, shape index: {}]   ;;  %s916_s1 = inlined_call_operand.hbm [shape: f32[8,128], index: 1, kind: input, shape index: {}]   ;;  %s917_s2 = inlined_call_operand.hbm [shape: f32[128,128], index: 2, kind: input, shape index: {}]   ;;  %s918_s3 = inlined_call_operand.vmem [shape: f32[1,128], index: 3, kind: input, shape index: {}]   ;;  %s919_s4 = inlined_call_operand.hbm [shape: f32[128,128], index: 4, kind: input, shape index: {}]   ;;  %s920_s5 = inlined_call_operand.vmem [shape: f32[1,128], index: 5, kind: input, shape index: {}]   ;;  %s921_s6 = inlined_call_operand.hbm [shape: f32[128,128], index: 6, kind: input, shape index: {}]   ;;  %s922_s7 = inlined_call_operand.vmem [shape: f32[1,128], index: 7, kind: input, shape index: {}]   ;;  %s923_s8 = inlined_call_operand.hbm [shape: f32[8,128], index: 8, kind: output, shape index: {}]  }
   0x1   :  { %15 = vsyncpa [#allocation7], 0 }
   0x2   :  { %16 = vsyncpa [#allocation10], 0 }
   0x3   :  { %17 = vsyncpa [#allocation5], 0  ;;  %s749_s27 = smov [#allocation6]   ;;  %s631_s9 = scalar_lea.hbm %s917_s2, 2048 }
   0x4   :  { %s35_s28 = sshll.u32 %s749_s27, 4  ;;  %p632_p0 = scmp.ne.s32.totalorder %s917_s2, %s631_s9  ;;  %s36_s28 = int_to_ptr.vmem [resolvable:$true] %s35_s28 }
   0x5   :  { %p635_p1 = scmp.lt.u32.totalorder %s631_s9, %s917_s2 }
   0x7   :  { %p637_p2 = pnand %p635_p1, %p632_p0 }
   0x9   :  { %640 = shalt.err (!%p637_p2)
}
   0xa   :  { %s641_s14 = scalar_lea.vmem %s36_s28, 2048  ;;  %p646_p4 = scmp.lt.s32.totalorder %s36_s28, %s36_s28 }
   0xb   :  { %p642_p3 = scmp.ne.s32.totalorder %s36_s28, %s641_s14  ;;  %p647_p5 = scmp.lt.s32.totalorder %s641_s14, %s641_s14 }
   0xd   :  { %p648_p6 = por %p647_p5, %p646_p4 }
   0xf   :  { %p649_p7 = pnand %p648_p6, %p642_p3 }
  0x11   :  { %652 = shalt.err (!%p649_p7)
}
  0x12   :  { %s750_s15 = smov 128   ;;  %s751_s16 = smov 8  }
  0x13   :  { %41 = dma.hbm_to_vmem [thread:$0]  %s917_s2, 2048, %s36_s28, [#allocation7], %s750_s15, %s750_s15, %s751_s16  }
  0x14   :  { %s752_s19 = smov [#allocation3]   ;;  %s753_s21 = smov [#allocation8]  }
  0x15   :  { %s26_s20 = sshll.u32 %s752_s19, 4  ;;  %s49_s22 = sshll.u32 %s753_s21, 4  ;;  %s27_s20 = int_to_ptr.vmem [resolvable:$true] %s26_s20  ;;  %s50_s22 = int_to_ptr.vmem [resolvable:$true] %s49_s22 }
  0x16   :  { %s653_s25 = scalar_lea.hbm %s916_s1, 128 }
  0x17   :  { %p654_p8 = scmp.ne.s32.totalorder %s916_s1, %s653_s25  ;;  %p657_p9 = scmp.lt.u32.totalorder %s653_s25, %s916_s1 }
  0x19   :  { %p659_p10 = pnand %p657_p9, %p654_p8 }
  0x1b   :  { %662 = shalt.err (!%p659_p10)
}
  0x1c   :  { %s663_s2 = scalar_lea.vmem %s27_s20, 128  ;;  %p668_p12 = scmp.lt.s32.totalorder %s27_s20, %s27_s20 }
  0x1d   :  { %p664_p11 = scmp.ne.s32.totalorder %s27_s20, %s663_s2  ;;  %p669_p13 = scmp.lt.s32.totalorder %s663_s2, %s663_s2 }
  0x1f   :  { %p670_p0 = por %p669_p13, %p668_p12 }
  0x21   :  { %p671_p1 = pnand %p670_p0, %p664_p11 }
  0x23   :  { %674 = shalt.err (!%p671_p1)
}
  0x24   :  { %29 = dma.hbm_to_vmem [thread:$0]  %s916_s1, 128, %s27_s20, [#allocation4]  }
  0x25   :  { %s675_s12 = scalar_lea.hbm %s919_s4, 2048 }
  0x26   :  { %p676_p2 = scmp.ne.s32.totalorder %s919_s4, %s675_s12  ;;  %p679_p3 = scmp.lt.u32.totalorder %s675_s12, %s919_s4 }
  0x28   :  { %p681_p4 = pnand %p679_p3, %p676_p2 }
  0x2a   :  { %684 = shalt.err (!%p681_p4)
}
  0x2b   :  { %s685_s19 = scalar_lea.vmem %s50_s22, 2048  ;;  %p690_p6 = scmp.lt.s32.totalorder %s50_s22, %s50_s22 }
  0x2c   :  { %p686_p5 = scmp.ne.s32.totalorder %s50_s22, %s685_s19  ;;  %p691_p7 = scmp.lt.s32.totalorder %s685_s19, %s685_s19 }
  0x2e   :  { %p692_p8 = por %p691_p7, %p690_p6 }
  0x30   :  { %p693_p9 = pnand %p692_p8, %p686_p5 }
  0x32   :  { %696 = shalt.err (!%p693_p9)
}
  0x33   :  { %55 = dma.hbm_to_vmem [thread:$0]  %s919_s4, 2048, %s50_s22, [#allocation7], %s750_s15, %s750_s15, %s751_s16  }
  0x34   :  { %s754_s21 = smov [#allocation9]   ;;  %s697_s26 = scalar_lea.hbm %s921_s6, 2048 }
  0x35   :  { %s63_s23 = sshll.u32 %s754_s21, 4  ;;  %p698_p10 = scmp.ne.s32.totalorder %s921_s6, %s697_s26  ;;  %s64_s23 = int_to_ptr.vmem [resolvable:$true] %s63_s23 }
  0x36   :  { %p701_p11 = scmp.lt.u32.totalorder %s697_s26, %s921_s6 }
  0x38   :  { %p703_p12 = pnand %p701_p11, %p698_p10 }
  0x3a   :  { %706 = shalt.err (!%p703_p12)
}
  0x3b   :  { %s707_s28 = scalar_lea.vmem %s64_s23, 2048  ;;  %p712_p0 = scmp.lt.s32.totalorder %s64_s23, %s64_s23 }
  0x3c   :  { %p708_p13 = scmp.ne.s32.totalorder %s64_s23, %s707_s28  ;;  %p713_p1 = scmp.lt.s32.totalorder %s707_s28, %s707_s28 }
  0x3e   :  { %p714_p2 = por %p713_p1, %p712_p0 }
  0x40   :  { %p715_p3 = pnand %p714_p2, %p708_p13 }
  0x42   :  { %718 = shalt.err (!%p715_p3)
}
  0x43   :  { %69 = dma.hbm_to_vmem [thread:$0]  %s921_s6, 2048, %s64_s23, [#allocation10], %s750_s15, %s750_s15, %s751_s16  }
  0x44   :  { %741 = dma.done.wait [#allocation4], 128  }
  0x45   :  { %742 = vsyncadd [#allocation4], 4294967168 }
  0x46   :  { %743 = dma.done.wait [#allocation7], 4096  }
  0x47   :  { %744 = vsyncadd [#allocation7], 4294963200 }
  0x48   :  { %745 = dma.done.wait [#allocation10], 2048  }
  0x49   :  { %746 = vsyncadd [#allocation10], 4294965248  ;;  %v755_v0 = vmov 0.0|0.0   ;;  %vm756_vm0 = vmmov 0   ;;  %v757_v1 = vmov 0.0   ;;  %v86_v2 = vld [vmem:[#allocation6] sm:$0xff] }
  0x4a   :  { %547 = vmatprep.subr.bf16.mxu0 %v755_v0  ;;  %474 = vmatprep.mubr.msk.f32.mxu0 %vm756_vm0, %v757_v1  ;;  %v87_v3 = vld [vmem:[#allocation6 + $0x8] sm:$0xff]  ;;  %v88_v4 = vld [vmem:[#allocation6 + $0x10] sm:$0xff]  ;;  %v89_v6 = vld [vmem:[#allocation6 + $0x18] sm:$0xff]  ;;  %s758_s13 = smov [#allocation11]  }
  0x4b   :  { %571 = vmatprep.subr.bf16.mxu1 %v755_v0  ;;  %509 = vmatprep.mubr.msk.f32.mxu1 %vm756_vm0, %v757_v1  ;;  %v548_v5 = vpack.c.bf16 %v87_v3, %v86_v2  ;;  %v551_v7 = vpack.c.bf16 %v89_v6, %v88_v4  ;;  %v90_v8 = vld [vmem:[#allocation6 + $0x20] sm:$0xff]  ;;  %v91_v9 = vld [vmem:[#allocation6 + $0x28] sm:$0xff]  ;;  %v182_v12 = vld [vmem:[#allocation8 + $0x10] sm:$0xff]  ;;  %s377_s14 = sshll.u32 %s758_s13, 4  ;;  %s378_s14 = int_to_ptr.vmem [resolvable:$true] %s377_s14 }
  0x4c   :  { %v180_v10 = vld [vmem:[#allocation8] sm:$0xff]  ;;  %v181_v11 = vld [vmem:[#allocation8 + $0x8] sm:$0xff]  ;;  %v183_v13 = vld [vmem:[#allocation8 + $0x18] sm:$0xff]  ;;  %v554_v14 = vpack.c.bf16 %v91_v9, %v90_v8  ;;  %p724_p5 = scmp.lt.s32.totalorder %s378_s14, %s378_s14 }
  0x4d   :  { %549 = vmatpush3.bf16.msra.mxu0 %v548_v5  ;;  %v572_v15 = vpack.c.bf16 %v181_v11, %v180_v10  ;;  %v92_v16 = vld [vmem:[#allocation6 + $0x30] sm:$0xff]  ;;  %v93_v17 = vld [vmem:[#allocation6 + $0x38] sm:$0xff]  ;;  %v575_v18 = vpack.c.bf16 %v183_v13, %v182_v12  ;;  %v184_v19 = vld [vmem:[#allocation8 + $0x20] sm:$0xff] }
  0x4e   :  { %550 = vmatprep.subr.bf16.mxu0 %v755_v0  ;;  %v185_v20 = vld [vmem:[#allocation8 + $0x28] sm:$0xff]  ;;  %v557_v21 = vpack.c.bf16 %v93_v17, %v92_v16  ;;  %v94_v22 = vld [vmem:[#allocation6 + $0x40] sm:$0xff]  ;;  %v186_v25 = vld [vmem:[#allocation8 + $0x30] sm:$0xff] }
  0x4f   :  { %573 = vmatpush3.bf16.msra.mxu1 %v572_v15  ;;  %v95_v23 = vld [vmem:[#allocation6 + $0x48] sm:$0xff]  ;;  %v578_v24 = vpack.c.bf16 %v185_v20, %v184_v19  ;;  %v187_v26 = vld [vmem:[#allocation8 + $0x38] sm:$0xff]  ;;  %v96_v28 = vld [vmem:[#allocation6 + $0x50] sm:$0xff] }
  0x50   :  { %574 = vmatprep.subr.bf16.mxu1 %v755_v0  ;;  %v560_v27 = vpack.c.bf16 %v95_v23, %v94_v22  ;;  %v97_v29 = vld [vmem:[#allocation6 + $0x58] sm:$0xff]  ;;  %v581_v30 = vpack.c.bf16 %v187_v26, %v186_v25  ;;  %v188_v31 = vld [vmem:[#allocation8 + $0x40] sm:$0xff]  ;;  %v189_v32 = vld [vmem:[#allocation8 + $0x48] sm:$0xff]  ;;  %v368_v25 = vstv %s915_s0 }
  0x51   :  { %552 = vmatpush3.bf16.msra.mxu0 %v551_v7  ;;  %v563_v33 = vpack.c.bf16 %v97_v29, %v96_v28  ;;  %v98_v34 = vld [vmem:[#allocation6 + $0x60] sm:$0xff]  ;;  %v99_v35 = vld [vmem:[#allocation6 + $0x68] sm:$0xff]  ;;  %v584_v36 = vpack.c.bf16 %v189_v32, %v188_v31  ;;  %v190_v37 = vld [vmem:[#allocation8 + $0x50] sm:$0xff] }
  0x52   :  { %553 = vmatprep.subr.bf16.mxu0 %v755_v0  ;;  %v191_v38 = vld [vmem:[#allocation8 + $0x58] sm:$0xff]  ;;  %v566_v39 = vpack.c.bf16 %v99_v35, %v98_v34  ;;  %v100_v40 = vld [vmem:[#allocation6 + $0x70] sm:$0xff]  ;;  %v192_v43 = vld [vmem:[#allocation8 + $0x60] sm:$0xff] }
  0x53   :  { %576 = vmatpush3.bf16.msra.mxu1 %v575_v18  ;;  %v101_v41 = vld [vmem:[#allocation6 + $0x78] sm:$0xff]  ;;  %v587_v42 = vpack.c.bf16 %v191_v38, %v190_v37  ;;  %v193_v44 = vld [vmem:[#allocation8 + $0x68] sm:$0xff]  ;;  %v194_v48 = vld [vmem:[#allocation8 + $0x70] sm:$0xff] }
  0x54   :  { %577 = vmatprep.subr.bf16.mxu1 %v755_v0  ;;  %v569_v45 = vpack.c.bf16 %v101_v41, %v100_v40  ;;  %v590_v46 = vpack.c.bf16 %v193_v44, %v192_v43  ;;  %v85_v47 = vld [vmem:[#allocation3] sm:$0xff]  ;;  %v274_v51 = vld [vmem:[#allocation9] sm:$0xff]  ;;  %v275_v52 = vld [vmem:[#allocation9 + $0x8] sm:$0xff] }
  0x55   :  { %555 = vmatpush3.bf16.msra.mxu0 %v554_v14  ;;  %v195_v49 = vld [vmem:[#allocation8 + $0x78] sm:$0xff]  ;;  %v276_v53 = vld [vmem:[#allocation9 + $0x10] sm:$0xff]  ;;  %v596_v54 = vpack.c.bf16 %v275_v52, %v274_v51  ;;  %v278_v57 = vld [vmem:[#allocation9 + $0x20] sm:$0xff] }
  0x56   :  { %556 = vmatprep.subr.bf16.mxu0 %v755_v0  ;;  %v593_v50 = vpack.c.bf16 %v195_v49, %v194_v48  ;;  %v277_v55 = vld [vmem:[#allocation9 + $0x18] sm:$0xff]  ;;  %v279_v58 = vld [vmem:[#allocation9 + $0x28] sm:$0xff]  ;;  %v280_v60 = vld [vmem:[#allocation9 + $0x30] sm:$0xff] }
  0x57   :  { %579 = vmatpush3.bf16.msra.mxu1 %v578_v24  ;;  %v599_v56 = vpack.c.bf16 %v277_v55, %v276_v53  ;;  %v602_v59 = vpack.c.bf16 %v279_v58, %v278_v57  ;;  %v281_v61 = vld [vmem:[#allocation9 + $0x38] sm:$0xff]  ;;  %v282_v63 = vld [vmem:[#allocation9 + $0x40] sm:$0xff]  ;;  %v284_v3 = vld [vmem:[#allocation9 + $0x50] sm:$0xff] }
  0x58   :  { %580 = vmatprep.subr.bf16.mxu1 %v755_v0  ;;  %v605_v62 = vpack.c.bf16 %v281_v61, %v280_v60  ;;  %v285_v4 = vld [vmem:[#allocation9 + $0x58] sm:$0xff]  ;;  %v286_v6 = vld [vmem:[#allocation9 + $0x60] sm:$0xff]  ;;  %v287_v7 = vld [vmem:[#allocation9 + $0x68] sm:$0xff] }
  0x59   :  { %558 = vmatpush3.bf16.msra.mxu0 %v557_v21  ;;  %v611_v5 = vpack.c.bf16 %v285_v4, %v284_v3  ;;  %v614_v8 = vpack.c.bf16 %v287_v7, %v286_v6  ;;  %v388_v9 = vld [vmem:[%s918_s3] ss:$0 sm:$0xff]  ;;  %v288_v14 = vld [vmem:[#allocation9 + $0x70] sm:$0xff] }
  0x5a   :  { %559 = vmatprep.subr.bf16.mxu0 %v755_v0  ;;  %v289_v15 = vld [vmem:[#allocation9 + $0x78] sm:$0xff] }
  0x5b   :  { %582 = vmatpush3.bf16.msra.mxu1 %v581_v30  ;;  %v617_v16 = vpack.c.bf16 %v289_v15, %v288_v14  ;;  %v389_v17 = vld [vmem:[%s920_s5] ss:$0 sm:$0xff]  ;;  %s719_s5 = scalar_lea.vmem %s378_s14, 128 }
  0x5c   :  { %583 = vmatprep.subr.bf16.mxu1 %v755_v0  ;;  %v390_v21 = vld [vmem:[%s922_s7] ss:$0 sm:$0xff]  ;;  %p720_p4 = scmp.ne.s32.totalorder %s378_s14, %s719_s5  ;;  %p725_p6 = scmp.lt.s32.totalorder %s719_s5, %s719_s5 }
  0x5d   :  { %561 = vmatpush3.bf16.msra.mxu0 %v560_v27 }
  0x5e   :  { %562 = vmatprep.subr.bf16.mxu0 %v755_v0  ;;  %p726_p7 = por %p725_p6, %p724_p5 }
  0x5f   :  { %585 = vmatpush3.bf16.msra.mxu1 %v584_v36 }
  0x60   :  { %586 = vmatprep.subr.bf16.mxu1 %v755_v0  ;;  %p727_p8 = pnand %p726_p7, %p720_p4 }
  0x61   :  { %564 = vmatpush3.bf16.msra.mxu0 %v563_v33 }
  0x62   :  { %565 = vmatprep.subr.bf16.mxu0 %v755_v0 }
  0x63   :  { %588 = vmatpush3.bf16.msra.mxu1 %v587_v42 }
  0x64   :  { %589 = vmatprep.subr.bf16.mxu1 %v755_v0 }
  0x65   :  { %567 = vmatpush3.bf16.msra.mxu0 %v566_v39 }
  0x66   :  { %568 = vmatprep.subr.bf16.mxu0 %v755_v0 }
  0x67   :  { %591 = vmatpush3.bf16.msra.mxu1 %v590_v46 }
  0x68   :  { %592 = vmatprep.subr.bf16.mxu1 %v755_v0 }
  0x69   :  { %570 = vmatpush3.bf16.msra.mxu0 %v569_v45 }
  0x6a   :  { %595 = vmatprep.subr.bf16.mxu0 %v755_v0 }
  0x6b   :  { %594 = vmatpush3.bf16.msra.mxu1 %v593_v50 }
  0x6c   :  { %475 = vmatmul.mubr.f32.vlgmr.msra.gmra.mrb[0].mxu0 %v85_v47 }
  0x6d   :  { %544 = vmatprep.mubr.msk.f32.mxu0 %vm756_vm0, %v757_v1  ;;  %597 = vmatpush3.bf16.msra.mxu0 %v596_v54  ;;  %v283_v1 = vld [vmem:[#allocation9 + $0x48] sm:$0xff] }
  0x6e   :  { %598 = vmatprep.subr.bf16.mxu0 %v755_v0  ;;  %v608_v2 = vpack.c.bf16 %v283_v1, %v282_v63 }
  0x71   :  { %600 = vmatpush3.bf16.msra.mxu0 %v599_v56 }
  0x72   :  { %601 = vmatprep.subr.bf16.mxu0 %v755_v0 }
  0x75   :  { %603 = vmatpush3.bf16.msra.mxu0 %v602_v59 }
  0x76   :  { %604 = vmatprep.subr.bf16.mxu0 %v755_v0 }
  0x79   :  { %606 = vmatpush3.bf16.msra.mxu0 %v605_v62 }
  0x7a   :  { %607 = vmatprep.subr.bf16.mxu0 %v755_v0 }
  0x7d   :  { %609 = vmatpush3.bf16.msra.mxu0 %v608_v2 }
  0x7e   :  { %610 = vmatprep.subr.bf16.mxu0 %v755_v0 }
  0x81   :  { %612 = vmatpush3.bf16.msra.mxu0 %v611_v5 }
  0x82   :  { %613 = vmatprep.subr.bf16.mxu0 %v755_v0 }
  0x85   :  { %615 = vmatpush3.bf16.msra.mxu0 %v614_v8 }
  0x86   :  { %616 = vmatprep.subr.bf16.mxu0 %v755_v0 }
  0x89   :  { %618 = vmatpush3.bf16.msra.mxu0 %v617_v16 }
 0x13f   :  { %v175_v10 = vpop.f32.mrb[0].mxu0 }
 0x140   :  { %v176_v11 = vadd.f32 %v388_v9, %v175_v10  ;;  %v476_v12 = vpop.f32.mrb[1].mxu0 }
 0x142   :  { %v179_v13 = vmax.f32 %v176_v11, 0.0 }
 0x144   :  { %510 = vmatmul.mubr.f32.vlgmr.msra.gmra.mrb[0].mxu1 %v179_v13 }
 0x217   :  { %v269_v18 = vpop.f32.mrb[0].mxu1 }
 0x218   :  { %v270_v19 = vadd.f32 %v389_v17, %v269_v18  ;;  %v511_v0 = vpop.f32.mrb[1].mxu1 }
 0x21a   :  { %v273_v20 = vmax.f32 %v270_v19, 0.0 }
 0x21c   :  { %545 = vmatmul.mubr.f32.vlgmr.msra.gmra.mrb[2].mxu0 %v273_v20 }
 0x2ef   :  { %v363_v22 = vpop.f32.mrb[2].mxu0 }
 0x2f0   :  { %v364_v23 = vadd.f32 %v390_v21, %v363_v22  ;;  %v546_v24 = vpop.f32.mrb[3].mxu0 }
 0x2f2   :  { %629 = vtanh.f32 %v364_v23 }
 0x2fc   :  { %v630_v26 = vpop.eup %629 }
 0x2fd   :  { %v369_v27 = vmul.f32 %v630_v26, %v368_v25 }
 0x2ff   :  { %370 = vst [vmem:[#allocation11] sm:$0xff] %v369_v27 }
 0x300   :  { %730 = shalt.err (!%p727_p8)
}
 0x301   :  { %s731_s18 = scalar_lea.hbm %s923_s8, 128 }
 0x302   :  { %p732_p9 = scmp.ne.s32.totalorder %s923_s8, %s731_s18  ;;  %p735_p10 = scmp.lt.u32.totalorder %s731_s18, %s923_s8 }
 0x304   :  { %p737_p11 = pnand %p735_p10, %p732_p9 }
 0x306   :  { %740 = shalt.err (!%p737_p11)
}
 0x307   :  { %380 = dma.vmem_to_hbm [thread:$0]  %s378_s14, 128, %s923_s8, [#allocation5]  }
 0x308   :  { %747 = dma.done.wait [#allocation5], 128  }
 0x309   :  { %748 = vsyncadd [#allocation5], 4294967168 }
 0x30a   :  { %384 = vsyncpa [#allocation4], 1 }
 0x30b   :  { %385 = vsyncpa [#allocation7], 1 }
 0x30c   :  { %386 = vsyncpa [#allocation10], 1 }
 0x30d   :  { %387 = vsyncpa [#allocation5], 1 }

</bundles_post_ra>
